<compile_context>
chip_gen: v7x
topology: tpu7x:2x2x1
jax: 0.10.0
libtpu: 0.0.40
codegen_flags: <defaults>
</compile_context>

<pallas_src>
import math

import jax
import jax.numpy as jnp
import numpy as np
from jax import lax
from jax.experimental import pallas as pl
from jax.experimental.pallas import tpu as pltpu


def _pts_attention_kernel(x_ref, proj_ref, sbias_ref, c_ref, out_ref):
    x = x_ref[...]                       # (C, TN)  input dtype
    proj = proj_ref[...]                 # (M, C)   mm_dtype
    c_t = c_ref[...]                     # (C, M)   mm_dtype

    # s[m, n] = sum_k proj[m, k] * x[k, n] + sbias[m]
    #         = (fc2(x_pt^T) @ fc1(x^T)^T)[m, n] / sqrt(C)
    s = jnp.dot(proj, x.astype(proj.dtype),
                preferred_element_type=jnp.float32) + sbias_ref[...]     # (M, TN)

    # softmax over M (sublane axis); kept unnormalized through the PV matmul.
    s_max = jnp.max(s, axis=0, keepdims=True)                            # (1, TN)
    e = jnp.exp(s - s_max)                                               # (M, TN) f32
    l = jnp.sum(e, axis=0, keepdims=True)                                # (1, TN)

    # pv[c, n] = sum_m c_t[c, m] * e[m, n]
    pv = jnp.dot(c_t, e.astype(c_t.dtype),
                 preferred_element_type=jnp.float32)                     # (C, TN)
    inv_l = pl.reciprocal(l, approx=False)                               # (1, TN)

    # Residual add in the input dtype (avoids an f32 upcast of x when bf16).
    out_ref[...] = (x + (pv * inv_l).astype(x.dtype)).astype(out_ref.dtype)


def _vmem_capacity_bytes():
    try:
        return int(pltpu.get_tpu_info().vmem_capacity_bytes)
    except Exception:
        return 64 * 1024 * 1024          # v7x per-TC capacity (smallest generation)


def _choose_tn(N, B, C, M, x_bytes, vmem_bytes):
    """Largest lane-tile (multiple of 128, or full N) whose double-buffered
    x/out blocks plus the f32 (M,TN)/(C,TN) intermediates fit ~60% of VMEM.
    Prefers a TN that divides N so the last tile stays lane-dense."""
    budget = int(vmem_bytes * 0.6)
    # per lane-column live bytes: x+out double-buffered + s,e (f32) + pv (f32)
    per_col = 4 * C * x_bytes + 2 * M * 4 + C * 4
    cap = (budget // max(per_col, 1)) // 128 * 128
    cap = int(max(128, min(cap, 2048)))
    if N <= cap:
        tn = N
    else:
        tn = cap
        for cand in range(cap, 127, -128):
            if N % cand == 0:
                tn = cand
                break
    # v7x has 2 TensorCores: make sure a B==1 call still has >=2 parallel steps.
    if B == 1 and N > 128 and pl.cdiv(N, tn) < 2:
        tn = 128 * pl.cdiv(pl.cdiv(N, 2), 128)
    return tn


def _vmem_limit_bytes(C, M, tn, x_bytes, mm_bytes, vmem_bytes):
    blocks = 2 * (2 * C * tn * x_bytes        # x + out, double-buffered
                  + M * C * mm_bytes          # proj
                  + M * 4                     # sbias
                  + C * M * mm_bytes)         # c_t
    scratch = (2 * M * tn + 2 * C * tn) * 4   # s, e, pv (+ temps), f32
    est = blocks + 2 * scratch + (4 << 20)
    return int(min(max(est, 32 << 20), int(vmem_bytes * 0.9)))


def init_params(key, dim_in):
    """fc1/fc2/fc3: xavier_uniform weights, PyTorch-default uniform bias."""
    keys = jax.random.split(key, 6)
    limit_w = math.sqrt(6.0 / (dim_in + dim_in))   # xavier_uniform, fan_in = fan_out
    limit_b = 1.0 / math.sqrt(dim_in)              # nn.Linear default bias init

    def w(k):
        return jax.random.uniform(k, (dim_in, dim_in), jnp.float32, -limit_w, limit_w)

    def b(k):
        return jax.random.uniform(k, (dim_in,), jnp.float32, -limit_b, limit_b)

    return (w(keys[0]), b(keys[1]), w(keys[2]), b(keys[3]), w(keys[4]), b(keys[5]))


def pts_attention(x, x_pt, params, *, mm_dtype=None):
    """Forward pass of Pts_attention.

    x:     (B, C, N) (or (B, C, *spatial) flattenable to N -- the residual add
           requires x to already carry the flattened spatial layout).
    x_pt:  (B, C, M)
    params: (w1, b1, w2, b2, w3, b3), torch nn.Linear layout (out_features, in_features).
    mm_dtype: optional dtype for the in-kernel MXU operands (pass jnp.bfloat16
           to get full-rate MXU for f32 callers); accumulation is always f32.
    """
    orig_shape = x.shape
    B, C = x.shape[:2]
    x_flat = x.reshape(B, C, -1)
    N = x_flat.shape[-1]
    M = x_pt.shape[-1]

    w1, b1, w2, b2, w3, b3 = params
    if mm_dtype is None:
        mm_dtype = x.dtype

    # ---- per-batch precompute (one tiny batched XLA matmul chain, f32) -----
    hi = lax.Precision.HIGHEST
    scale = 1.0 / math.sqrt(C)
    xpt_t = jnp.transpose(x_pt, (0, 2, 1)).astype(jnp.float32)            # (B, M, C)
    b2_out = jnp.einsum('bmc,dc->bmd', xpt_t, w2, precision=hi) + b2      # fc2(x_pt^T)
    c = jnp.einsum('bmc,dc->bmd', b2_out, w3, precision=hi) + b3          # fc3(fc2(.))
    proj = jnp.einsum('bmc,ck->bmk', b2_out, w1, precision=hi) * scale    # (B, M, C)
    sbias = (jnp.einsum('bmc,c->bm', b2_out, b1, precision=hi) * scale)[..., None]
    c_t = jnp.transpose(c, (0, 2, 1))                                     # (B, C, M)

    proj = proj.astype(mm_dtype)
    c_t = c_t.astype(mm_dtype)
    sbias = sbias.astype(jnp.float32)

    # ---- tiling -------------------------------------------------------------
    x_bytes = jnp.dtype(x.dtype).itemsize
    mm_bytes = jnp.dtype(mm_dtype).itemsize
    vmem = _vmem_capacity_bytes()
    tn = _choose_tn(N, B, C, M, x_bytes, vmem)
    grid = (B, pl.cdiv(N, tn))

    out = pl.pallas_call(
        _pts_attention_kernel,
        out_shape=jax.ShapeDtypeStruct((B, C, N), x.dtype),
        grid_spec=pltpu.PrefetchScalarGridSpec(
            num_scalar_prefetch=0,
            grid=grid,
            in_specs=[
                pl.BlockSpec((None, C, tn), lambda b, n: (b, 0, n)),   # x tile
                pl.BlockSpec((None, M, C), lambda b, n: (b, 0, 0)),    # proj
                pl.BlockSpec((None, M, 1), lambda b, n: (b, 0, 0)),    # sbias
                pl.BlockSpec((None, C, M), lambda b, n: (b, 0, 0)),    # c_t
            ],
            out_specs=pl.BlockSpec((None, C, tn), lambda b, n: (b, 0, n)),
        ),
        compiler_params=pltpu.CompilerParams(
            dimension_semantics=("parallel", "parallel"),
            vmem_limit_bytes=_vmem_limit_bytes(C, M, tn, x_bytes, mm_bytes, vmem)),
    )(x_flat, proj, sbias, c_t)

    return out.reshape(orig_shape)


def pts_attention_ref(x, x_pt, params):
    """Pure-JAX reference mirroring the PyTorch forward exactly."""
    w1, b1, w2, b2, w3, b3 = params
    hi = lax.Precision.HIGHEST
    B, C = x.shape[:2]
    a = jnp.transpose(x.reshape(B, C, -1), (0, 2, 1))                    # (B, N, C)
    b = jnp.transpose(x_pt, (0, 2, 1))                                   # (B, M, C)
    a = jnp.einsum('bnc,dc->bnd', a, w1, precision=hi) + b1              # fc1
    b = jnp.einsum('bmc,dc->bmd', b, w2, precision=hi) + b2              # fc2
    c = jnp.einsum('bmc,dc->bmd', b, w3, precision=hi) + b3              # fc3 of fc2's output
    score = jnp.einsum('bmc,bnc->bmn', b, a, precision=hi) / math.sqrt(b.shape[-1])
    atten = jax.nn.softmax(jnp.transpose(score, (0, 2, 1)), axis=-1)     # (B, N, M)
    atten_map = jnp.einsum('bnm,bmc->bnc', atten, c, precision=hi)       # (B, N, C)
    return x + jnp.transpose(atten_map, (0, 2, 1)).reshape(x.shape)


if __name__ == "__main__":
    B, C, N, M = 2, 32, 16, 8   # dim_in = C

    key = jax.random.PRNGKey(0)
    kx, kpt, kp = jax.random.split(key, 3)
    x = jax.random.normal(kx, (B, C, N), jnp.float32)
    x_pt = jax.random.normal(kpt, (B, C, M), jnp.float32)
    params = init_params(kp, C)

    out = jax.block_until_ready(pts_attention(x, x_pt, params))
    ref = jax.block_until_ready(pts_attention_ref(x, x_pt, params))

    np.testing.assert_allclose(np.asarray(out), np.asarray(ref),
                               rtol=1e-3, atol=5e-4)

    print("KERNEL_OK")
</pallas_src>

<mosaic_0001>
module attributes {stable_mosaic.version = 11 : i64} {
  func.func @_pts_attention_kernel(%arg0: i32, %arg1: i32, %arg2: memref<1x32x16xf32, #tpu.memory_space<vmem>>, %arg3: memref<1x8x32xf32, #tpu.memory_space<vmem>>, %arg4: memref<1x8x1xf32, #tpu.memory_space<vmem>>, %arg5: memref<1x32x8xf32, #tpu.memory_space<vmem>>, %arg6: memref<1x32x16xf32, #tpu.memory_space<vmem>>) attributes {dimension_semantics = [#tpu.dimension_semantics<parallel>, #tpu.dimension_semantics<parallel>], iteration_bounds = array<i64: 2, 1>, scalar_prefetch = 0 : i64, scratch_operands = 0 : i64, tpu.core_type = #tpu.core_type<tc>, window_params = [{transform_indices = @transform_0, window_bounds = array<i64: 1, 32, 16>}, {transform_indices = @transform_1, window_bounds = array<i64: 1, 8, 32>}, {transform_indices = @transform_2, window_bounds = array<i64: 1, 8, 1>}, {transform_indices = @transform_3, window_bounds = array<i64: 1, 32, 8>}, {transform_indices = @transform_4, window_bounds = array<i64: 1, 32, 16>}]} {
    %c0 = arith.constant 0 : index
    %c0_0 = arith.constant 0 : index
    %c0_1 = arith.constant 0 : index
    %0 = vector.load %arg2[%c0, %c0_0, %c0_1] : memref<1x32x16xf32, #tpu.memory_space<vmem>>, vector<1x32x16xf32>
    %1 = vector.shape_cast %0 : vector<1x32x16xf32> to vector<32x16xf32>
    %c0_2 = arith.constant 0 : index
    %c0_3 = arith.constant 0 : index
    %c0_4 = arith.constant 0 : index
    %2 = vector.load %arg3[%c0_2, %c0_3, %c0_4] : memref<1x8x32xf32, #tpu.memory_space<vmem>>, vector<1x8x32xf32>
    %3 = vector.shape_cast %2 : vector<1x8x32xf32> to vector<8x32xf32>
    %c0_5 = arith.constant 0 : index
    %c0_6 = arith.constant 0 : index
    %c0_7 = arith.constant 0 : index
    %4 = vector.load %arg5[%c0_5, %c0_6, %c0_7] : memref<1x32x8xf32, #tpu.memory_space<vmem>>, vector<1x32x8xf32>
    %5 = vector.shape_cast %4 : vector<1x32x8xf32> to vector<32x8xf32>
    %cst = arith.constant dense<0.000000e+00> : vector<8x16xf32>
    %6 = tpu.matmul %3, %1, %cst {dimension_numbers = #tpu.dot_dimension_numbers<[1], [0], [0], [1], [0, 0, 1, 1], [], []>} : vector<8x32xf32>, vector<32x16xf32>, vector<8x16xf32> -> vector<8x16xf32>
    %c0_8 = arith.constant 0 : index
    %c0_9 = arith.constant 0 : index
    %c0_10 = arith.constant 0 : index
    %7 = vector.load %arg4[%c0_8, %c0_9, %c0_10] : memref<1x8x1xf32, #tpu.memory_space<vmem>>, vector<1x8x1xf32>
    %8 = vector.shape_cast %7 : vector<1x8x1xf32> to vector<8x1xf32>
    %9 = vector.broadcast %8 : vector<8x1xf32> to vector<8x16xf32>
    %10 = arith.addf %6, %9 : vector<8x16xf32>
    %cst_11 = arith.constant dense<0xFF800000> : vector<16xf32>
    %11 = vector.multi_reduction <maximumf>, %10, %cst_11 [0] : vector<8x16xf32> to vector<16xf32>
    %12 = vector.shape_cast %11 : vector<16xf32> to vector<1x16xf32>
    %13 = vector.broadcast %12 : vector<1x16xf32> to vector<8x16xf32>
    %14 = arith.subf %10, %13 : vector<8x16xf32>
    %15 = math.exp %14 : vector<8x16xf32>
    %cst_12 = arith.constant dense<0.000000e+00> : vector<16xf32>
    %16 = vector.multi_reduction <add>, %15, %cst_12 [0] : vector<8x16xf32> to vector<16xf32>
    %17 = vector.shape_cast %16 : vector<16xf32> to vector<1x16xf32>
    %cst_13 = arith.constant dense<0.000000e+00> : vector<32x16xf32>
    %18 = tpu.matmul %5, %15, %cst_13 {dimension_numbers = #tpu.dot_dimension_numbers<[1], [0], [0], [1], [0, 0, 1, 1], [], []>} : vector<32x8xf32>, vector<8x16xf32>, vector<32x16xf32> -> vector<32x16xf32>
    %19 = tpu.reciprocal %17 : vector<1x16xf32> -> vector<1x16xf32>
    %20 = vector.broadcast %19 : vector<1x16xf32> to vector<32x16xf32>
    %21 = arith.mulf %18, %20 : vector<32x16xf32>
    %22 = arith.addf %1, %21 : vector<32x16xf32>
    %c0_14 = arith.constant 0 : index
    %c0_15 = arith.constant 0 : index
    %c0_16 = arith.constant 0 : index
    %23 = vector.load %arg6[%c0_14, %c0_15, %c0_16] : memref<1x32x16xf32, #tpu.memory_space<vmem>>, vector<1x32x16xf32>
    %24 = vector.shape_cast %23 : vector<1x32x16xf32> to vector<32x16xf32>
    %25 = vector.shape_cast %22 : vector<32x16xf32> to vector<1x32x16xf32>
    tpu.vector_store %arg6[%c0_14, %c0_15, %c0_16], %25 {strides = array<i32>} : memref<1x32x16xf32, #tpu.memory_space<vmem>>, vector<1x32x16xf32>,
    return
  }
  func.func @transform_0(%arg0: i32, %arg1: i32) -> (i32, i32, i32) {
    %c0_i32 = arith.constant 0 : i32
    %c0_i32_0 = arith.constant 0 : i32
    return %arg0, %c0_i32, %arg1 : i32, i32, i32
  }
  func.func @transform_1(%arg0: i32, %arg1: i32) -> (i32, i32, i32) {
    %c0_i32 = arith.constant 0 : i32
    %c0_i32_0 = arith.constant 0 : i32
    %c0_i32_1 = arith.constant 0 : i32
    return %arg0, %c0_i32, %c0_i32_0 : i32, i32, i32
  }
  func.func @transform_2(%arg0: i32, %arg1: i32) -> (i32, i32, i32) {
    %c0_i32 = arith.constant 0 : i32
    %c0_i32_0 = arith.constant 0 : i32
    %c0_i32_1 = arith.constant 0 : i32
    return %arg0, %c0_i32, %c0_i32_0 : i32, i32, i32
  }
  func.func @transform_3(%arg0: i32, %arg1: i32) -> (i32, i32, i32) {
    %c0_i32 = arith.constant 0 : i32
    %c0_i32_0 = arith.constant 0 : i32
    %c0_i32_1 = arith.constant 0 : i32
    return %arg0, %c0_i32, %c0_i32_0 : i32, i32, i32
  }
  func.func @transform_4(%arg0: i32, %arg1: i32) -> (i32, i32, i32) {
    %c0_i32 = arith.constant 0 : i32
    %c0_i32_0 = arith.constant 0 : i32
    return %arg0, %c0_i32, %arg1 : i32, i32, i32
  }
}

</mosaic_0001>

<bundles_post_ra>
// kernel: tpu_custom_call.1
= control target key start
LH: loop header
LB: loop body
LE: loop exit
PB: predicated region body
PF: predicated region fallthrough
CT: control target
= control target key end

     0   :  { %s764_s15 = smov 0   ;;  %s766_s16 = smov 0   ;;  %s825_s0 = inlined_call_operand.vmem [shape: f32[2,32,16], index: 0, kind: input, shape index: {}]   ;;  %s826_s1 = inlined_call_operand.vmem [shape: f32[2,8,32], index: 1, kind: input, shape index: {}]   ;;  %s827_s2 = inlined_call_operand.vmem [shape: f32[2,8,1], index: 2, kind: input, shape index: {}]   ;;  %s828_s3 = inlined_call_operand.vmem [shape: f32[2,32,8], index: 3, kind: input, shape index: {}]   ;;  %s829_s4 = inlined_call_operand.vmem [shape: f32[2,32,16], index: 4, kind: output, shape index: {}]  }
   0x1   :  { %s768_s17 = smov 0  }
   0x2 LB: > { %s26_s18 = sadd.s32 1, %s729_s16  ;;  %p624_p0 = scmp.ge.s32.totalorder %s733_s17, 1  ;;  %s733_s17 = sphi %s768_s17, %s14_s17   ;;  %s729_s16 = sphi %s766_s16, %s831_s16   ;;  %s725_s15 = sphi %s764_s15, %s830_s15  }
   0x3   : > { %p28_p1 = scmp.ge.s32.totalorder %s26_s18, 2  ;;  %p209_p2 = scmp.lt.s32.totalorder %s733_s17, 3 }
   0x5   : > { %s833_s18 = smov (%p28_p1, %s26_s18), 0  ;;  %p210_p3 = pnand %p624_p0, %p209_p2 }
   0x6   : > { %p254_p4 = scmp.lt.s32.totalorder (!%p210_p3), %s725_s15, 1  ;;  %v735_v0 = vmov (!%p210_p3), 0.0|0.0   ;;  %vm736_vm0 = vmmov (!%p210_p3), 0   ;;  %v737_v1 = vmov (!%p210_p3), 0.0   ;;  %v738_v2 = vmov (!%p210_p3), 0  }
   0x7   : > { %213 = sbr.rel (%p210_p3) target bundleno = 493 (0x1ed), region = 36  ;;  %672 = vmatprep.subr.bf16.mxu0 (!%p210_p3), %v735_v0  ;;  %661 = vmatprep.mubr.msk.f32.mxu0 (!%p210_p3), %vm736_vm0, %v737_v1  ;;  %vm298_vm1 = vcmask (!%p210_p3), 261120   ;;  %vm390_vm2 = vcmask (!%p210_p3), 64512   ;;  %vm372_vm3 = vcmask (!%p210_p3), 130048  }
   0x8   : > { %706 = vset.pattern.permute.xlu0 (!%p210_p3), %v738_v2 }
   0xe   : > { %s835_s15 = smov (!%p254_p4, %s725_s15), 1 }
   0xf   : > { %s782_s19 = sshll.u32 %s835_s15, 5  ;;  %s627_s23 = sshll.u32 %s835_s15, 3 }
  0x10   : > { %s261_s22 = scalar_lea.vmem %s825_s0, %s782_s19  ;;  %s269_s26 = scalar_lea.vmem %s827_s2, %s627_s23 }
  0x11   : > { %v283_v3 = vld [vmem:[%s261_s22] sm:$0xff]  ;;  %v284_v4 = vld [vmem:[%s261_s22 + $0x8] sm:$0xff]  ;;  %v788_v5 = vld [vmem:[%s261_s22 + $0x10] sm:$0xff]  ;;  %s265_s29 = scalar_lea.vmem %s826_s1, %s627_s23  ;;  %s274_s6 = scalar_lea.vmem %s828_s3, %s782_s19 }
  0x12   : > { %v673_v6 = vpack.c.bf16 %v284_v4, %v283_v3  ;;  %v286_v7 = vld [vmem:[%s261_s22 + $0x18] sm:$0xff]  ;;  %v292_v8 = vld [vmem:[%s269_s26] sm:$0xff]  ;;  %v289_v26 = vld [vmem:[%s274_s6 + $0x8] sm:$0xff]  ;;  %s282_s9 = scalar_lea.vmem %s829_s4, %s782_s19 }
  0x13   : > { %295 = vperm.xlu0 %706, %v292_v8   ;;  %v676_v9 = vpack.c.bf16 %v286_v7, %v788_v5  ;;  %v287_v10 = vld [vmem:[%s265_s29] sm:$0xff]  ;;  %v290_v27 = vld [vmem:[%s274_s6 + $0x10] sm:$0xff]  ;;  %v291_v28 = vld [vmem:[%s274_s6 + $0x18] sm:$0xff] }
  0x14   : > { %674 = vmatpush3.bf16.msra.mxu0 %v673_v6  ;;  %v288_v11 = vld [vmem:[%s274_s6] sm:$0xff] }
  0x15   : > { %675 = vmatprep.subr.bf16.mxu0 %v735_v0  ;;  %666 = vmatprep.mubr.msk.f32.mxu1 %vm390_vm2, %v288_v11 }
  0x18   : > { %677 = vmatpush3.bf16.msra.mxu0 %v676_v9 }
  0x1b   : > { %662 = vmatmul.mubr.msk.f32.vlgmr.msra.gmra.mrb[0].mxu0 %vm298_vm1, %v287_v10 }
  0x92   : > { %v296_v12 = vpop.permute.xlu0 %295 }
  0xee   : > { %v368_v13 = vpop.f32.mrb[0].mxu0 }
  0xef   : > { %v369_v14 = vadd.f32 %v368_v13, %v296_v12  ;;  %v663_v15 = vpop.f32.mrb[1].mxu0 }
  0xf1   : > { %v373_v16 = vsel %vm372_vm3, %v369_v14, -inf }
  0xf2   : > { %v374_v17 = vrot.slane %v373_v16, 4 }
  0xf4   : > { %v375_v18 = vmax.f32 %v373_v16, %v374_v17 }
  0xf6   : > { %v376_v19 = vrot.slane %v375_v18, 2 }
  0xf8   : > { %v377_v20 = vmax.f32 %v375_v18, %v376_v19 }
  0xfa   : > { %v378_v21 = vrot.slane %v377_v20, 1 }
  0xfc   : > { %v379_v22 = vmax.f32 %v377_v20, %v378_v21 }
  0xfe   : > { %v380_v23 = vsub.f32 %v369_v14, %v379_v22 }
 0x100   : > { %v381_v24 = vmul.f32 1.442695, %v380_v23 }
 0x102   : > { %707 = vpow2.f32 %v381_v24 }
 0x10c   : > { %v708_v25 = vpop.eup %707 }
 0x10d   : > { %664 = vmatprep.subr.mxu1 %v708_v25  ;;  %v383_v29 = vsel %vm372_vm3, %v708_v25, 0.0 }
 0x10e   : > { %665 = vmatpush3.msra.mxu1 %v708_v25  ;;  %v384_v30 = vrot.slane %v383_v29, 4 }
 0x10f   : > { %667 = vmatmul.mubr.msk.f32.vlgmr.msra.gmra.mrb[0].mxu1 %vm390_vm2, %v289_v26 }
 0x110   : > { %669 = vmatprep.mubr.msk.f32.mxu1 %vm390_vm2, %v290_v27  ;;  %v385_v31 = vadd.f32 %v384_v30, %v383_v29 }
 0x112   : > { %v386_v32 = vrot.slane %v385_v31, 2 }
 0x113   : > { %670 = vmatmul.mubr.msk.f32.gmra.mrb[2].mxu1 %vm390_vm2, %v291_v28 }
 0x114   : > { %v387_v33 = vadd.f32 %v386_v32, %v385_v31 }
 0x116   : > { %v388_v34 = vrot.slane %v387_v33, 1 }
 0x118   : > { %v389_v35 = vadd.f32 %v388_v34, %v387_v33 }
 0x11a   : > { %709 = vrcp.f32 %v389_v35 }
 0x124   : > { %v710_v36 = vpop.eup %709 }
 0x1e2   : > { %v668_v37 = vpop.f32.mrb[0].mxu1 }
 0x1e3   : > { %v490_v38 = vmul.f32 %v710_v36, %v668_v37  ;;  %v469_v39 = vpop.f32.mrb[1].mxu1 }
 0x1e4   : > { %v489_v40 = vmul.f32 %v710_v36, %v469_v39 }
 0x1e5   : > { %v494_v41 = vadd.f32 %v490_v38, %v284_v4 }
 0x1e6   : > { %v493_v42 = vadd.f32 %v489_v40, %v283_v3  ;;  %v671_v43 = vpop.f32.mrb[2].mxu1 }
 0x1e7   : > { %498 = vst.msk [vmem:[%s282_s9 + $0x8] sm:$0xff] %vm372_vm3, %v494_v41  ;;  %v492_v44 = vmul.f32 %v710_v36, %v671_v43  ;;  %v479_v45 = vpop.f32.mrb[3].mxu1 }
 0x1e8   : > { %497 = vst.msk [vmem:[%s282_s9] sm:$0xff] %vm372_vm3, %v493_v42  ;;  %v491_v46 = vmul.f32 %v710_v36, %v479_v45 }
 0x1e9   : > { %v496_v47 = vadd.f32 %v492_v44, %v286_v7 }
 0x1ea   : > { %v495_v48 = vadd.f32 %v491_v46, %v788_v5 }
 0x1eb   : > { %500 = vst.msk [vmem:[%s282_s9 + $0x18] sm:$0xff] %vm372_vm3, %v496_v47 }
 0x1ec   : > { %499 = vst.msk [vmem:[%s282_s9 + $0x10] sm:$0xff] %vm372_vm3, %v495_v48 }
 0x1ed PF: > { %s14_s17 = sadd.s32 1, %s733_s17   ;;  %s830_s15 = smov %s729_s16 }
 0x1ee   : > { %p11_p5 = scmp.ge.s32.totalorder %s14_s17, 4   ;;  %s831_s16 = smov %s833_s18 }
 0x1f0   :  { %13 = sbr.rel (!%p11_p5) target bundleno = 2 (0x2), region = 75 }

</bundles_post_ra>
